<compile_context>
chip_gen: v5e
topology: v5e:2x2
jax: 0.10.0
libtpu: 0.0.40
codegen_flags: <defaults>
</compile_context>

<pallas_src>
import jax
import jax.numpy as jnp
from jax.experimental import pallas as pl
from jax.experimental.pallas import tpu as pltpu

LANE = 128     # TPU lane width; pad feature dims to multiples of this.
SUBLANE = 8    # sublane quantum for the batch (second-minor) dim.


def _round_up(n, m):
    return ((n + m - 1) // m) * m


def _pad_to(a, shape):
    pads = [(0, s - d) for d, s in zip(a.shape, shape)]
    if all(p == (0, 0) for p in pads):
        return a
    return jnp.pad(a, pads)


def _classifier_kernel(x_ref, w1_ref, b1_ref, w2_ref, b2_ref, w3_ref, b3_ref,
                       out_ref):
    compute_dtype = w1_ref.dtype

    x = x_ref[...]                                                # (TB, Dp), bf16

    # ln1 + ReLU  (accumulate f32, bias/ReLU in f32)
    h1 = jnp.dot(x, w1_ref[...], preferred_element_type=jnp.float32)
    h1 = jnp.maximum(h1 + b1_ref[...], 0.0)                       # (TB, H1p) f32

    # ln2 + ReLU
    h2 = jnp.dot(h1.astype(compute_dtype), w2_ref[...],
                 preferred_element_type=jnp.float32)
    h2 = jnp.maximum(h2 + b2_ref[...], 0.0)                       # (TB, H2p) f32

    # ln3 (logits, no activation) — lane-dense (128-wide) padded output block.
    out = jnp.dot(h2.astype(compute_dtype), w3_ref[...],
                  preferred_element_type=jnp.float32)
    out_ref[...] = (out + b3_ref[...]).astype(out_ref.dtype)


def classifier_forward(x, params, *, tile_b=256, compute_dtype=jnp.bfloat16):
    """x: (B, input_dim) f32. params: dict of w1,b1,w2,b2,w3,b3 (f32).

    Returns f32 logits of shape (B, num_class).
    """
    w1, b1 = params["w1"], params["b1"]
    w2, b2 = params["w2"], params["b2"]
    w3, b3 = params["w3"], params["b3"]

    B, D = x.shape
    H1, H2, C = w1.shape[1], w2.shape[1], w3.shape[1]

    # Lane-pad every feature dimension (MXU full width, lane-dense stores).
    Dp = _round_up(D, LANE)
    H1p = _round_up(H1, LANE)
    H2p = _round_up(H2, LANE)
    Cp = _round_up(C, LANE)

    # Batch tile: multiple of 8 sublanes, clamped to the (padded) batch.
    tb = max(SUBLANE, _round_up(min(tile_b, _round_up(B, SUBLANE)), SUBLANE))
    Bp = _round_up(B, tb)

    cd = compute_dtype
    xp = _pad_to(x, (Bp, Dp)).astype(cd)
    w1p = _pad_to(w1, (Dp, H1p)).astype(cd)
    w2p = _pad_to(w2, (H1p, H2p)).astype(cd)
    w3p = _pad_to(w3, (H2p, Cp)).astype(cd)
    b1p = _pad_to(b1, (1, H1p)).astype(jnp.float32)
    b2p = _pad_to(b2, (1, H2p)).astype(jnp.float32)
    b3p = _pad_to(b3, (1, Cp)).astype(jnp.float32)

    grid = (Bp // tb,)

    # Advisory cost hint for XLA scheduling around the custom call.
    isz = jnp.dtype(cd).itemsize
    flops = 2 * Bp * (Dp * H1p + H1p * H2p + H2p * Cp)
    bytes_accessed = (Bp * Dp * isz                       # x in
                      + (Dp * H1p + H1p * H2p + H2p * Cp) * isz   # weights
                      + (H1p + H2p + Cp) * 4              # biases
                      + Bp * Cp * 4)                      # logits out
    cost = pl.CostEstimate(flops=flops, transcendentals=0,
                           bytes_accessed=bytes_accessed)

    def resident(shape):
        # Weight/bias blocks: same block for every grid step -> stay in VMEM.
        return pl.BlockSpec(shape, lambda i: (0, 0))

    out_padded = pl.pallas_call(
        _classifier_kernel,
        out_shape=jax.ShapeDtypeStruct((Bp, Cp), jnp.float32),
        grid=grid,
        in_specs=[
            pl.BlockSpec((tb, Dp), lambda i: (i, 0)),     # x: tiled over batch
            resident((Dp, H1p)), resident((1, H1p)),      # w1, b1
            resident((H1p, H2p)), resident((1, H2p)),     # w2, b2
            resident((H2p, Cp)), resident((1, Cp)),       # w3, b3
        ],
        out_specs=pl.BlockSpec((tb, Cp), lambda i: (i, 0)),
        compiler_params=pltpu.CompilerParams(
            dimension_semantics=("parallel",)),
        cost_estimate=cost,
    )(xp, w1p, b1p, w2p, b2p, w3p, b3p)

    return out_padded[:B, :C]


def init_params(key, input_dim, hidden_dim1, hidden_dim2, num_class):
    """Deterministic init mimicking nn.Linear default (U[-1/sqrt(fan_in), +])."""
    ks = jax.random.split(key, 6)

    def linear(kw, kb, fan_in, fan_out):
        bound = 1.0 / jnp.sqrt(jnp.float32(fan_in))
        # Stored as (in, out) = transpose of PyTorch's (out, in).
        w = jax.random.uniform(kw, (fan_in, fan_out), jnp.float32, -bound, bound)
        b = jax.random.uniform(kb, (1, fan_out), jnp.float32, -bound, bound)
        return w, b

    w1, b1 = linear(ks[0], ks[1], input_dim, hidden_dim1)
    w2, b2 = linear(ks[2], ks[3], hidden_dim1, hidden_dim2)
    w3, b3 = linear(ks[4], ks[5], hidden_dim2, num_class)
    return {"w1": w1, "b1": b1, "w2": w2, "b2": b2, "w3": w3, "b3": b3}


def _reference_forward(x, p, compute_dtype=jnp.float32):
    """Plain-JAX reference of the same math (optionally with bf16 matmul operands)."""
    cd = compute_dtype
    h1 = jnp.dot(x.astype(cd), p["w1"].astype(cd),
                 preferred_element_type=jnp.float32) + p["b1"]
    h1 = jnp.maximum(h1, 0.0)
    h2 = jnp.dot(h1.astype(cd), p["w2"].astype(cd),
                 preferred_element_type=jnp.float32) + p["b2"]
    h2 = jnp.maximum(h2, 0.0)
    return jnp.dot(h2.astype(cd), p["w3"].astype(cd),
                   preferred_element_type=jnp.float32) + p["b3"]


if __name__ == "__main__":
    # Small shapes consistent with the module's forward pass.
    batch = 8
    input_dim = 32
    hidden_dim1 = 64
    hidden_dim2 = 32
    num_class = 4

    key = jax.random.PRNGKey(0)
    k_x, k_p = jax.random.split(key)

    x = jax.random.normal(k_x, (batch, input_dim), jnp.float32)
    params = init_params(k_p, input_dim, hidden_dim1, hidden_dim2, num_class)

    out = jax.block_until_ready(classifier_forward(x, params))
    assert out.shape == (batch, num_class)
    assert out.dtype == jnp.float32

    # Tight check vs. a reference using the same bf16 matmul operands
    # (zero padding is numerically exact, so these should agree closely).
    ref_bf16 = jax.block_until_ready(
        _reference_forward(x, params, compute_dtype=jnp.bfloat16))
    assert jnp.allclose(out, ref_bf16, atol=1e-4, rtol=1e-4)

    # Loose check vs. the pure-f32 math of the original PyTorch module.
    ref_f32 = jax.block_until_ready(_reference_forward(x, params))
    assert jnp.allclose(out, ref_f32, atol=5e-2, rtol=5e-2)

    print("KERNEL_OK")
</pallas_src>

<mosaic_0001>
module attributes {stable_mosaic.version = 11 : i64} {
  func.func @_classifier_kernel(%arg0: i32, %arg1: memref<8x128xbf16, #tpu.memory_space<vmem>>, %arg2: memref<128x128xbf16, #tpu.memory_space<vmem>>, %arg3: memref<1x128xf32, #tpu.memory_space<vmem>>, %arg4: memref<128x128xbf16, #tpu.memory_space<vmem>>, %arg5: memref<1x128xf32, #tpu.memory_space<vmem>>, %arg6: memref<128x128xbf16, #tpu.memory_space<vmem>>, %arg7: memref<1x128xf32, #tpu.memory_space<vmem>>, %arg8: memref<8x128xf32, #tpu.memory_space<vmem>>) attributes {dimension_semantics = [#tpu.dimension_semantics<parallel>], iteration_bounds = array<i64: 1>, scalar_prefetch = 0 : i64, scratch_operands = 0 : i64, tpu.core_type = #tpu.core_type<tc>, window_params = [{transform_indices = @transform_0, window_bounds = array<i64: 8, 128>}, {pipeline_mode = #tpu.pipeline_mode<synchronous>, transform_indices = @transform_1, window_bounds = array<i64: 128, 128>}, {pipeline_mode = #tpu.pipeline_mode<synchronous>, transform_indices = @transform_2, window_bounds = array<i64: 1, 128>}, {pipeline_mode = #tpu.pipeline_mode<synchronous>, transform_indices = @transform_3, window_bounds = array<i64: 128, 128>}, {pipeline_mode = #tpu.pipeline_mode<synchronous>, transform_indices = @transform_4, window_bounds = array<i64: 1, 128>}, {pipeline_mode = #tpu.pipeline_mode<synchronous>, transform_indices = @transform_5, window_bounds = array<i64: 128, 128>}, {pipeline_mode = #tpu.pipeline_mode<synchronous>, transform_indices = @transform_6, window_bounds = array<i64: 1, 128>}, {transform_indices = @transform_7, window_bounds = array<i64: 8, 128>}]} {
    %c0 = arith.constant 0 : index
    %c0_0 = arith.constant 0 : index
    %0 = vector.load %arg1[%c0, %c0_0] : memref<8x128xbf16, #tpu.memory_space<vmem>>, vector<8x128xbf16>
    %c0_1 = arith.constant 0 : index
    %c0_2 = arith.constant 0 : index
    %1 = vector.load %arg2[%c0_1, %c0_2] : memref<128x128xbf16, #tpu.memory_space<vmem>>, vector<128x128xbf16>
    %cst = arith.constant dense<0.000000e+00> : vector<8x128xf32>
    %2 = tpu.matmul %0, %1, %cst {dimension_numbers = #tpu.dot_dimension_numbers<[1], [0], [0], [1], [0, 0, 1, 1], [], []>} : vector<8x128xbf16>, vector<128x128xbf16>, vector<8x128xf32> -> vector<8x128xf32>
    %c0_3 = arith.constant 0 : index
    %c0_4 = arith.constant 0 : index
    %3 = vector.load %arg3[%c0_3, %c0_4] : memref<1x128xf32, #tpu.memory_space<vmem>>, vector<1x128xf32>
    %4 = vector.broadcast %3 : vector<1x128xf32> to vector<8x128xf32>
    %5 = arith.addf %2, %4 : vector<8x128xf32>
    %cst_5 = arith.constant 0.000000e+00 : f32
    %6 = vector.broadcast %cst_5 : f32 to vector<8x128xf32>
    %7 = arith.maximumf %5, %6 : vector<8x128xf32>
    %8 = arith.truncf %7 : vector<8x128xf32> to vector<8x128xbf16>
    %c0_6 = arith.constant 0 : index
    %c0_7 = arith.constant 0 : index
    %9 = vector.load %arg4[%c0_6, %c0_7] : memref<128x128xbf16, #tpu.memory_space<vmem>>, vector<128x128xbf16>
    %cst_8 = arith.constant dense<0.000000e+00> : vector<8x128xf32>
    %10 = tpu.matmul %8, %9, %cst_8 {dimension_numbers = #tpu.dot_dimension_numbers<[1], [0], [0], [1], [0, 0, 1, 1], [], []>} : vector<8x128xbf16>, vector<128x128xbf16>, vector<8x128xf32> -> vector<8x128xf32>
    %c0_9 = arith.constant 0 : index
    %c0_10 = arith.constant 0 : index
    %11 = vector.load %arg5[%c0_9, %c0_10] : memref<1x128xf32, #tpu.memory_space<vmem>>, vector<1x128xf32>
    %12 = vector.broadcast %11 : vector<1x128xf32> to vector<8x128xf32>
    %13 = arith.addf %10, %12 : vector<8x128xf32>
    %cst_11 = arith.constant 0.000000e+00 : f32
    %14 = vector.broadcast %cst_11 : f32 to vector<8x128xf32>
    %15 = arith.maximumf %13, %14 : vector<8x128xf32>
    %16 = arith.truncf %15 : vector<8x128xf32> to vector<8x128xbf16>
    %c0_12 = arith.constant 0 : index
    %c0_13 = arith.constant 0 : index
    %17 = vector.load %arg6[%c0_12, %c0_13] : memref<128x128xbf16, #tpu.memory_space<vmem>>, vector<128x128xbf16>
    %cst_14 = arith.constant dense<0.000000e+00> : vector<8x128xf32>
    %18 = tpu.matmul %16, %17, %cst_14 {dimension_numbers = #tpu.dot_dimension_numbers<[1], [0], [0], [1], [0, 0, 1, 1], [], []>} : vector<8x128xbf16>, vector<128x128xbf16>, vector<8x128xf32> -> vector<8x128xf32>
    %c0_15 = arith.constant 0 : index
    %c0_16 = arith.constant 0 : index
    %19 = vector.load %arg7[%c0_15, %c0_16] : memref<1x128xf32, #tpu.memory_space<vmem>>, vector<1x128xf32>
    %20 = vector.broadcast %19 : vector<1x128xf32> to vector<8x128xf32>
    %21 = arith.addf %18, %20 : vector<8x128xf32>
    %c0_17 = arith.constant 0 : index
    %c0_18 = arith.constant 0 : index
    %22 = vector.load %arg8[%c0_17, %c0_18] : memref<8x128xf32, #tpu.memory_space<vmem>>, vector<8x128xf32>
    tpu.vector_store %arg8[%c0_17, %c0_18], %21 {strides = array<i32>} : memref<8x128xf32, #tpu.memory_space<vmem>>, vector<8x128xf32>,
    return
  }
  func.func @transform_0(%arg0: i32) -> (i32, i32) {
    %c0_i32 = arith.constant 0 : i32
    %c0_i32_0 = arith.constant 0 : i32
    return %arg0, %c0_i32 : i32, i32
  }
  func.func @transform_1(%arg0: i32) -> (i32, i32) {
    %c0_i32 = arith.constant 0 : i32
    %c0_i32_0 = arith.constant 0 : i32
    %c0_i32_1 = arith.constant 0 : i32
    return %c0_i32, %c0_i32_0 : i32, i32
  }
  func.func @transform_2(%arg0: i32) -> (i32, i32) {
    %c0_i32 = arith.constant 0 : i32
    %c0_i32_0 = arith.constant 0 : i32
    %c0_i32_1 = arith.constant 0 : i32
    return %c0_i32, %c0_i32_0 : i32, i32
  }
  func.func @transform_3(%arg0: i32) -> (i32, i32) {
    %c0_i32 = arith.constant 0 : i32
    %c0_i32_0 = arith.constant 0 : i32
    %c0_i32_1 = arith.constant 0 : i32
    return %c0_i32, %c0_i32_0 : i32, i32
  }
  func.func @transform_4(%arg0: i32) -> (i32, i32) {
    %c0_i32 = arith.constant 0 : i32
    %c0_i32_0 = arith.constant 0 : i32
    %c0_i32_1 = arith.constant 0 : i32
    return %c0_i32, %c0_i32_0 : i32, i32
  }
  func.func @transform_5(%arg0: i32) -> (i32, i32) {
    %c0_i32 = arith.constant 0 : i32
    %c0_i32_0 = arith.constant 0 : i32
    %c0_i32_1 = arith.constant 0 : i32
    return %c0_i32, %c0_i32_0 : i32, i32
  }
  func.func @transform_6(%arg0: i32) -> (i32, i32) {
    %c0_i32 = arith.constant 0 : i32
    %c0_i32_0 = arith.constant 0 : i32
    %c0_i32_1 = arith.constant 0 : i32
    return %c0_i32, %c0_i32_0 : i32, i32
  }
  func.func @transform_7(%arg0: i32) -> (i32, i32) {
    %c0_i32 = arith.constant 0 : i32
    %c0_i32_0 = arith.constant 0 : i32
    return %arg0, %c0_i32 : i32, i32
  }
}

</mosaic_0001>

<bundles_post_ra>
// kernel: tpu_custom_call.1
= control target key start
LH: loop header
LB: loop body
LE: loop exit
PB: predicated region body
PF: predicated region fallthrough
CT: control target
= control target key end

     0   :  { %12 = vsyncpa [#allocation3], 0  ;;  %s685_s0 = inlined_call_operand.hbm [shape: bf16[8,128], index: 0, kind: input, shape index: {}]   ;;  %s686_s1 = inlined_call_operand.hbm [shape: bf16[128,128], index: 1, kind: input, shape index: {}]   ;;  %s687_s2 = inlined_call_operand.vmem [shape: f32[1,128], index: 2, kind: input, shape index: {}]   ;;  %s688_s3 = inlined_call_operand.hbm [shape: bf16[128,128], index: 3, kind: input, shape index: {}]   ;;  %s689_s4 = inlined_call_operand.vmem [shape: f32[1,128], index: 4, kind: input, shape index: {}]   ;;  %s690_s5 = inlined_call_operand.hbm [shape: bf16[128,128], index: 5, kind: input, shape index: {}]   ;;  %s691_s6 = inlined_call_operand.vmem [shape: f32[1,128], index: 6, kind: input, shape index: {}]   ;;  %s692_s7 = inlined_call_operand.hbm [shape: f32[8,128], index: 7, kind: output, shape index: {}]  }
   0x1   :  { %13 = vsyncpa [#allocation6], 0 }
   0x2   :  { %14 = vsyncpa [#allocation9], 0  ;;  %s31_s26 = sshll.u32 %s686_s1, 4  ;;  %s32_s26 = int_to_ptr.hbm [resolvable:$true] %s31_s26 }
   0x3   :  { %15 = vsyncpa [#allocation4], 0  ;;  %s614_s27 = smov [#allocation5]   ;;  %s21_s8 = sshll.u32 %s685_s0, 4  ;;  %s22_s8 = int_to_ptr.hbm [resolvable:$true] %s21_s8 }
   0x4   :  { %s33_s28 = sshll.u32 %s614_s27, 4  ;;  %s615_s9 = smov 64   ;;  %s34_s28 = int_to_ptr.vmem [resolvable:$true] %s33_s28 }
   0x5   :  { %s616_s10 = smov 4   ;;  %s617_s11 = smov [#allocation2]  }
   0x6   :  { %39 = dma.hbm_to_vmem [thread:$0]  %s32_s26, 1024, %s34_s28, [#allocation6], %s615_s9, %s615_s9, %s616_s10  }
   0x7   :  { %s23_s12 = sshll.u32 %s617_s11, 4  ;;  %s46_s15 = sshll.u32 %s688_s3, 4  ;;  %s24_s12 = int_to_ptr.vmem [resolvable:$true] %s23_s12  ;;  %s47_s15 = int_to_ptr.hbm [resolvable:$true] %s46_s15 }
   0x8   :  { %26 = dma.hbm_to_vmem [thread:$0]  %s22_s8, 64, %s24_s12, [#allocation3]  }
   0x9   :  { %s61_s17 = sshll.u32 %s690_s5, 4  ;;  %s618_s18 = smov [#allocation7]   ;;  %s62_s17 = int_to_ptr.hbm [resolvable:$true] %s61_s17 }
   0xa   :  { %s48_s19 = sshll.u32 %s618_s18, 4  ;;  %s619_s0 = smov [#allocation8]   ;;  %s49_s19 = int_to_ptr.vmem [resolvable:$true] %s48_s19 }
   0xb   :  { %54 = dma.hbm_to_vmem [thread:$0]  %s47_s15, 1024, %s49_s19, [#allocation6], %s615_s9, %s615_s9, %s616_s10  }
   0xc   :  { %s63_s20 = sshll.u32 %s619_s0, 4  ;;  %s64_s20 = int_to_ptr.vmem [resolvable:$true] %s63_s20 }
   0xd   :  { %69 = dma.hbm_to_vmem [thread:$0]  %s62_s17, 1024, %s64_s20, [#allocation9], %s615_s9, %s615_s9, %s616_s10  }
   0xe   :  { %606 = dma.done.wait [#allocation3], 64  }
   0xf   :  { %607 = vsyncadd [#allocation3], 4294967232 }
  0x10   :  { %608 = dma.done.wait [#allocation6], 2048  }
  0x11   :  { %609 = vsyncadd [#allocation6], 4294965248 }
  0x12   :  { %610 = dma.done.wait [#allocation9], 1024  }
  0x13   :  { %611 = vsyncadd [#allocation9], 4294966272  ;;  %v459_v0 = vld [vmem:[#allocation5 + $0x38] sm:$0xff]  ;;  %v458_v1 = vld [vmem:[#allocation5 + $0x30] sm:$0xff]  ;;  %s620_s24 = smov [#allocation10]   ;;  %s344_s28 = sshll.u32 %s692_s7, 4  ;;  %s345_s28 = int_to_ptr.hbm [resolvable:$true] %s344_s28 }
  0x14   :  { %157 = vmatpush.bf16.msra.mxu0 %v459_v0  ;;  %v467_v2 = vld [vmem:[#allocation7 + $0x38] sm:$0xff]  ;;  %v466_v3 = vld [vmem:[#allocation7 + $0x30] sm:$0xff]  ;;  %v457_v4 = vld [vmem:[#allocation5 + $0x28] sm:$0xff]  ;;  %s342_s25 = sshll.u32 %s620_s24, 4  ;;  %s343_s25 = int_to_ptr.vmem [resolvable:$true] %s342_s25 }
  0x15   :  { %240 = vmatpush.bf16.msra.mxu1 %v467_v2  ;;  %v465_v5 = vld [vmem:[#allocation7 + $0x28] sm:$0xff]  ;;  %v456_v6 = vld [vmem:[#allocation5 + $0x20] sm:$0xff]  ;;  %v455_v8 = vld [vmem:[#allocation5 + $0x18] sm:$0xff] }
  0x16   :  { %v464_v7 = vld [vmem:[#allocation7 + $0x20] sm:$0xff]  ;;  %v463_v9 = vld [vmem:[#allocation7 + $0x18] sm:$0xff]  ;;  %v454_v10 = vld [vmem:[#allocation5 + $0x10] sm:$0xff] }
  0x17   :  { %v462_v11 = vld [vmem:[#allocation7 + $0x10] sm:$0xff]  ;;  %v453_v12 = vld [vmem:[#allocation5 + $0x8] sm:$0xff]  ;;  %v452_v13 = vld [vmem:[#allocation5] sm:$0xff] }
  0x18   :  { %158 = vmatpush.bf16.msra.mxu0 %v458_v1  ;;  %v88_v14 = vld [vmem:[#allocation2] sm:$0xf]  ;;  %v461_v15 = vld [vmem:[#allocation7 + $0x8] sm:$0xff]  ;;  %v460_v16 = vld [vmem:[#allocation7] sm:$0xff] }
  0x19   :  { %241 = vmatpush.bf16.msra.mxu1 %v466_v3  ;;  %v475_v17 = vld [vmem:[#allocation8 + $0x38] sm:$0xff]  ;;  %v474_v18 = vld [vmem:[#allocation8 + $0x30] sm:$0xff]  ;;  %v473_v19 = vld [vmem:[#allocation8 + $0x28] sm:$0xff] }
  0x1a   :  { %323 = vmatpush.bf16.msra.mxu2 %v475_v17  ;;  %v472_v20 = vld [vmem:[#allocation8 + $0x20] sm:$0xff]  ;;  %v471_v21 = vld [vmem:[#allocation8 + $0x18] sm:$0xff]  ;;  %v470_v22 = vld [vmem:[#allocation8 + $0x10] sm:$0xff] }
  0x1b   :  { %v483_v23 = vld [vmem:[%s687_s2] ss:$0 sm:$0xff]  ;;  %v469_v29 = vld [vmem:[#allocation8 + $0x8] sm:$0xff]  ;;  %v468_v30 = vld [vmem:[#allocation8] sm:$0xff] }
  0x1c   :  { %159 = vmatpush.bf16.msra.mxu0 %v457_v4  ;;  %v484_v31 = vld [vmem:[%s689_s4] ss:$0 sm:$0xff] }
  0x1d   :  { %242 = vmatpush.bf16.msra.mxu1 %v465_v5  ;;  %v485_v37 = vld [vmem:[%s691_s6] ss:$0 sm:$0xff] }
  0x1e   :  { %324 = vmatpush.bf16.msra.mxu2 %v474_v18 }
  0x20   :  { %160 = vmatpush.bf16.msra.mxu0 %v456_v6 }
  0x21   :  { %243 = vmatpush.bf16.msra.mxu1 %v464_v7 }
  0x22   :  { %325 = vmatpush.bf16.msra.mxu2 %v473_v19 }
  0x24   :  { %161 = vmatpush.bf16.msra.mxu0 %v455_v8 }
  0x25   :  { %244 = vmatpush.bf16.msra.mxu1 %v463_v9 }
  0x26   :  { %326 = vmatpush.bf16.msra.mxu2 %v472_v20 }
  0x28   :  { %162 = vmatpush.bf16.msra.mxu0 %v454_v10 }
  0x29   :  { %245 = vmatpush.bf16.msra.mxu1 %v462_v11 }
  0x2a   :  { %327 = vmatpush.bf16.msra.mxu2 %v471_v21 }
  0x2c   :  { %163 = vmatpush.bf16.msra.mxu0 %v453_v12 }
  0x2d   :  { %246 = vmatpush.bf16.msra.mxu1 %v461_v15 }
  0x2e   :  { %328 = vmatpush.bf16.msra.mxu2 %v470_v22 }
  0x30   :  { %164 = vmatpush.bf16.msra.mxu0 %v452_v13 }
  0x31   :  { %247 = vmatpush.bf16.msra.mxu1 %v460_v16 }
  0x32   :  { %329 = vmatpush.bf16.msra.mxu2 %v469_v29 }
  0x33   :  { %165 = vmatmul.bf16.vlgmr.msra.gmra.mxu0 %v88_v14 }
  0x36   :  { %330 = vmatpush.bf16.msra.mxu2 %v468_v30 }
  0xb0   :  { %v166_v24 = vpop.f32.mrf.mxu0 }
  0xb1   :  { %v167_v25 = vadd.f32 %v483_v23, %v166_v24 }
  0xb3   :  { %v170_v26 = vmax.f32 %v167_v25, 0.0 }
  0xb5   :  { %v171_v27 = vpack.c.bf16 %v170_v26, %v170_v26 }
  0xb7   :  { %248 = vmatmul.bf16.vlgmr.msra.gmra.mxu1 %v171_v27 }
  0xb8   :  { %v168_v28 = vpop.f32.mrf.mxu0 }
 0x134   :  { %v249_v32 = vpop.f32.mrf.mxu1 }
 0x135   :  { %v250_v33 = vadd.f32 %v484_v31, %v249_v32 }
 0x137   :  { %v253_v34 = vmax.f32 %v250_v33, 0.0 }
 0x139   :  { %v254_v35 = vpack.c.bf16 %v253_v34, %v253_v34 }
 0x13b   :  { %331 = vmatmul.bf16.vlgmr.msra.gmra.mxu2 %v254_v35 }
 0x13c   :  { %v251_v36 = vpop.f32.mrf.mxu1 }
 0x1be   :  { %v332_v38 = vpop.f32.mrf.mxu2 }
 0x1bf   :  { %v333_v39 = vadd.f32 %v485_v37, %v332_v38 }
 0x1c1   :  { %336 = vst [vmem:[#allocation10] sm:$0xff] %v333_v39 }
 0x1c2   :  { %347 = dma.vmem_to_hbm [thread:$0]  %s343_s25, 128, %s345_s28, [#allocation4]  }
 0x1c6   :  { %v334_v40 = vpop.f32.mrf.mxu2 }
 0x1c7   :  { %612 = dma.done.wait [#allocation4], 128  }
 0x1c8   :  { %613 = vsyncadd [#allocation4], 4294967168 }
 0x1c9   :  { %352 = vsyncpa [#allocation3], 1 }
 0x1ca   :  { %353 = vsyncpa [#allocation6], 1 }
 0x1cb   :  { %354 = vsyncpa [#allocation9], 1 }
 0x1cc   :  { %355 = vsyncpa [#allocation4], 1 }

</bundles_post_ra>
